<compile_context>
chip_gen: v6e
topology: v6e:2x2x1
jax: 0.10.0
libtpu: 0.0.40
codegen_flags: <defaults>
</compile_context>

<pallas_src>
import functools

import jax
import jax.numpy as jnp
import numpy as np
from jax.experimental import pallas as pl
from jax.experimental.pallas import tpu as pltpu

BN_EPS = 1e-5


# ---------------- Pallas kernels ----------------

def _conv_stats_kernel(w_ref, p_ref, o_ref, s_ref, q_ref, *, apply_relu):
    """Tap-folded conv GEMM (+ optional ReLU) + per-tile BN partial stats.

    w_ref: (Cout, K)  bf16, K = 27*Cin   (resident weights)
    p_ref: (K, TM)    bf16               (im2col patch tile, voxels on lanes)
    o_ref: (Cout, TM)                    (conv[+relu] output tile)
    s_ref/q_ref: (1, Cout, 1) f32        (per-tile sum / sum-of-squares)
    """
    t = jnp.dot(w_ref[...], p_ref[...], preferred_element_type=jnp.float32)
    if apply_relu:
        t = jnp.maximum(t, 0.0)
    o_ref[...] = t.astype(o_ref.dtype)
    s_ref[0] = jnp.sum(t, axis=1, keepdims=True)
    q_ref[0] = jnp.sum(t * t, axis=1, keepdims=True)


def _conv2_down_kernel(w2_ref, p2_ref, wd_ref, xs_ref,
                       y_ref, ys_ref, yq_ref, r_ref, rs_ref, rq_ref):
    """conv2 GEMM + 1x1 down-conv GEMM, each with per-tile BN partial stats."""
    y = jnp.dot(w2_ref[...], p2_ref[...], preferred_element_type=jnp.float32)
    y_ref[...] = y
    ys_ref[0] = jnp.sum(y, axis=1, keepdims=True)
    yq_ref[0] = jnp.sum(y * y, axis=1, keepdims=True)

    r = jnp.dot(wd_ref[...], xs_ref[...], preferred_element_type=jnp.float32)
    r_ref[...] = r
    rs_ref[0] = jnp.sum(r, axis=1, keepdims=True)
    rq_ref[0] = jnp.sum(r * r, axis=1, keepdims=True)


def _affine_kernel(h_ref, a_ref, c_ref, o_ref):
    """Per-channel BN affine: o = a*h + c (a, c broadcast over lanes)."""
    o_ref[...] = (h_ref[...].astype(jnp.float32) * a_ref[...]
                  + c_ref[...]).astype(o_ref.dtype)


def _finalize_id_kernel(y_ref, res_ref, a2_ref, c2_ref, o_ref):
    """BN2 affine + identity residual + ReLU."""
    o_ref[...] = jnp.maximum(
        y_ref[...] * a2_ref[...] + c2_ref[...] + res_ref[...], 0.0)


def _finalize_down_kernel(y_ref, r_ref, a2_ref, c2_ref, ad_ref, cd_ref, o_ref):
    """BN2 affine + (BN_down affine on down-conv output) + add + ReLU."""
    bn2 = y_ref[...] * a2_ref[...] + c2_ref[...]
    bnd = r_ref[...] * ad_ref[...] + cd_ref[...]
    o_ref[...] = jnp.maximum(bn2 + bnd, 0.0)


# ---------------- pallas_call wrappers ----------------

def _pick_tile(m):
    for t in (1024, 512, 256, 128):
        if m % t == 0:
            return t
    return m


def _grid_params():
    return pltpu.CompilerParams(dimension_semantics=("parallel",))


def _conv_stats_call(wmat, patches, out_dtype, apply_relu):
    cout, k = wmat.shape
    _, m = patches.shape
    tm = _pick_tile(m)
    g = m // tm
    kern = functools.partial(_conv_stats_kernel, apply_relu=apply_relu)
    return pl.pallas_call(
        kern,
        out_shape=(jax.ShapeDtypeStruct((cout, m), out_dtype),
                   jax.ShapeDtypeStruct((g, cout, 1), jnp.float32),
                   jax.ShapeDtypeStruct((g, cout, 1), jnp.float32)),
        grid_spec=pltpu.PrefetchScalarGridSpec(
            num_scalar_prefetch=0,
            grid=(g,),
            in_specs=[
                pl.BlockSpec((cout, k), lambda i: (0, 0)),   # resident weights
                pl.BlockSpec((k, tm), lambda i: (0, i)),
            ],
            out_specs=(
                pl.BlockSpec((cout, tm), lambda i: (0, i)),
                pl.BlockSpec((1, cout, 1), lambda i: (i, 0, 0)),
                pl.BlockSpec((1, cout, 1), lambda i: (i, 0, 0)),
            ),
        ),
        compiler_params=_grid_params(),
    )(wmat, patches)


def _conv2_down_call(w2, p2, wd, xs):
    cout, k2 = w2.shape
    _, m = p2.shape
    cin = wd.shape[1]
    tm = _pick_tile(m)
    g = m // tm
    return pl.pallas_call(
        _conv2_down_kernel,
        out_shape=(jax.ShapeDtypeStruct((cout, m), jnp.float32),
                   jax.ShapeDtypeStruct((g, cout, 1), jnp.float32),
                   jax.ShapeDtypeStruct((g, cout, 1), jnp.float32),
                   jax.ShapeDtypeStruct((cout, m), jnp.float32),
                   jax.ShapeDtypeStruct((g, cout, 1), jnp.float32),
                   jax.ShapeDtypeStruct((g, cout, 1), jnp.float32)),
        grid_spec=pltpu.PrefetchScalarGridSpec(
            num_scalar_prefetch=0,
            grid=(g,),
            in_specs=[
                pl.BlockSpec((cout, k2), lambda i: (0, 0)),
                pl.BlockSpec((k2, tm), lambda i: (0, i)),
                pl.BlockSpec((cout, cin), lambda i: (0, 0)),
                pl.BlockSpec((cin, tm), lambda i: (0, i)),
            ],
            out_specs=(
                pl.BlockSpec((cout, tm), lambda i: (0, i)),
                pl.BlockSpec((1, cout, 1), lambda i: (i, 0, 0)),
                pl.BlockSpec((1, cout, 1), lambda i: (i, 0, 0)),
                pl.BlockSpec((cout, tm), lambda i: (0, i)),
                pl.BlockSpec((1, cout, 1), lambda i: (i, 0, 0)),
                pl.BlockSpec((1, cout, 1), lambda i: (i, 0, 0)),
            ),
        ),
        compiler_params=_grid_params(),
    )(w2, p2, wd, xs)


def _affine_call(h, a, c, out_dtype):
    cout, m = h.shape
    tm = _pick_tile(m)
    g = m // tm
    return pl.pallas_call(
        _affine_kernel,
        out_shape=jax.ShapeDtypeStruct((cout, m), out_dtype),
        grid_spec=pltpu.PrefetchScalarGridSpec(
            num_scalar_prefetch=0,
            grid=(g,),
            in_specs=[
                pl.BlockSpec((cout, tm), lambda i: (0, i)),
                pl.BlockSpec((cout, 1), lambda i: (0, 0)),
                pl.BlockSpec((cout, 1), lambda i: (0, 0)),
            ],
            out_specs=pl.BlockSpec((cout, tm), lambda i: (0, i)),
        ),
        compiler_params=_grid_params(),
    )(h, a, c)


def _finalize_id_call(y, res, a2, c2):
    cout, m = y.shape
    tm = _pick_tile(m)
    g = m // tm
    vec = lambda i: (0, 0)
    return pl.pallas_call(
        _finalize_id_kernel,
        out_shape=jax.ShapeDtypeStruct((cout, m), jnp.float32),
        grid_spec=pltpu.PrefetchScalarGridSpec(
            num_scalar_prefetch=0,
            grid=(g,),
            in_specs=[
                pl.BlockSpec((cout, tm), lambda i: (0, i)),
                pl.BlockSpec((cout, tm), lambda i: (0, i)),
                pl.BlockSpec((cout, 1), vec),
                pl.BlockSpec((cout, 1), vec),
            ],
            out_specs=pl.BlockSpec((cout, tm), lambda i: (0, i)),
        ),
        compiler_params=_grid_params(),
    )(y, res, a2, c2)


def _finalize_down_call(y, r, a2, c2, ad, cd):
    cout, m = y.shape
    tm = _pick_tile(m)
    g = m // tm
    vec = lambda i: (0, 0)
    return pl.pallas_call(
        _finalize_down_kernel,
        out_shape=jax.ShapeDtypeStruct((cout, m), jnp.float32),
        grid_spec=pltpu.PrefetchScalarGridSpec(
            num_scalar_prefetch=0,
            grid=(g,),
            in_specs=[
                pl.BlockSpec((cout, tm), lambda i: (0, i)),
                pl.BlockSpec((cout, tm), lambda i: (0, i)),
                pl.BlockSpec((cout, 1), vec),
                pl.BlockSpec((cout, 1), vec),
                pl.BlockSpec((cout, 1), vec),
                pl.BlockSpec((cout, 1), vec),
            ],
            out_specs=pl.BlockSpec((cout, tm), lambda i: (0, i)),
        ),
        compiler_params=_grid_params(),
    )(y, r, a2, c2, ad, cd)


# ---------------- glue (data movement / tiny scalar math only) ----------------

def _im2col_cfirst(xp, ksize, stride, do, ho, wo):
    """xp: (C, N, Dp, Hp, Wp) padded, channels first.

    Returns (ksize^3 * C, N*do*ho*wo) with row index = tap*C + c
    (tap = kd*ksize^2 + kh*ksize + kw), matching the tap-folded weight layout.
    """
    c = xp.shape[0]
    rows = []
    for kd in range(ksize):
        for kh in range(ksize):
            for kw in range(ksize):
                sl = xp[:, :,
                        kd:kd + (do - 1) * stride + 1:stride,
                        kh:kh + (ho - 1) * stride + 1:stride,
                        kw:kw + (wo - 1) * stride + 1:stride]
                rows.append(sl.reshape(c, -1))
    return jnp.concatenate(rows, axis=0)


def _fold_weight(w):
    """(Cout, Cin, 3, 3, 3) -> (Cout, 27*Cin), column index = tap*Cin + c."""
    cout, cin = w.shape[0], w.shape[1]
    return jnp.transpose(w, (0, 2, 3, 4, 1)).reshape(cout, 27 * cin)


def _bn_affine(ssum, ssq, gamma, beta, count):
    """Per-channel BN (training batch stats) as affine: bn(x) = a*x + c."""
    mean = jnp.sum(ssum, axis=0)[:, 0] / count
    ex2 = jnp.sum(ssq, axis=0)[:, 0] / count
    var = ex2 - mean * mean                      # one-pass biased variance
    a = gamma * jax.lax.rsqrt(var + BN_EPS)
    c = beta - mean * a
    return (a.reshape(-1, 1).astype(jnp.float32),
            c.reshape(-1, 1).astype(jnp.float32))


def resblock_forward(x_ncdhw, params, stride=1):
    n, cin, d, h, w = x_ncdhw.shape
    cout = params["w1"].shape[0]
    has_down = (stride > 1) or (cin != cout)

    do = (d - 1) // stride + 1
    ho = (h - 1) // stride + 1
    wo = (w - 1) // stride + 1
    m = n * do * ho * wo
    assert m % 128 == 0, "flattened voxel count must be lane-aligned (x128)"

    f32, bf16 = jnp.float32, jnp.bfloat16

    xt = jnp.transpose(x_ncdhw.astype(f32), (1, 0, 2, 3, 4))   # (Cin, N, D, H, W)
    xt_pad = jnp.pad(xt, ((0, 0), (0, 0), (1, 1), (1, 1), (1, 1)))

    # --- conv1 (tap-folded GEMM) + ReLU + BN1 partial stats (Pallas) ---
    p1 = _im2col_cfirst(xt_pad.astype(bf16), 3, stride, do, ho, wo)  # (27*Cin, M)
    w1m = _fold_weight(params["w1"]).astype(bf16)
    h1, s1, q1 = _conv_stats_call(w1m, p1, bf16, apply_relu=True)
    a1, c1 = _bn_affine(s1, q1, params["g1"], params["b1"], m)

    # --- BN1 normalize (Pallas affine pass) ---
    bn1 = _affine_call(h1, a1, c1, bf16)                             # (Cout, M)

    # --- conv2 patches (zero-padded BN1 output) ---
    bn1_pad = jnp.pad(bn1.reshape(cout, n, do, ho, wo),
                      ((0, 0), (0, 0), (1, 1), (1, 1), (1, 1)))
    p2 = _im2col_cfirst(bn1_pad, 3, 1, do, ho, wo)                   # (27*Cout, M)
    w2m = _fold_weight(params["w2"]).astype(bf16)

    if has_down:
        xs = xt[:, :, ::stride, ::stride, ::stride].reshape(cin, m)  # f32
        wdm = params["wd"].reshape(cout, cin).astype(f32)
        y, s2, q2, r, sr, qr = _conv2_down_call(w2m, p2, wdm, xs)
        a2, c2 = _bn_affine(s2, q2, params["g2"], params["b2"], m)
        ad, cd = _bn_affine(sr, qr, params["gd"], params["bd"], m)
        out2d = _finalize_down_call(y, r, a2, c2, ad, cd)
    else:
        res = xt.reshape(cout, m)                                    # Cin == Cout
        y, s2, q2 = _conv_stats_call(w2m, p2, f32, apply_relu=False)
        a2, c2 = _bn_affine(s2, q2, params["g2"], params["b2"], m)
        out2d = _finalize_id_call(y, res, a2, c2)

    out = out2d.reshape(cout, n, do, ho, wo)
    return jnp.transpose(out, (1, 0, 2, 3, 4))                       # NCDHW


# ---------------- pure-JAX reference (for verification) ----------------

def _conv3d_ref(x, w, stride, pad):
    return jax.lax.conv_general_dilated(
        x, w, window_strides=(stride,) * 3, padding=[(pad, pad)] * 3,
        dimension_numbers=("NCDHW", "OIDHW", "NCDHW"))


def _bn_ref(x, g, b):
    mean = x.mean(axis=(0, 2, 3, 4), keepdims=True)
    var = ((x - mean) ** 2).mean(axis=(0, 2, 3, 4), keepdims=True)
    return ((x - mean) * jax.lax.rsqrt(var + BN_EPS)
            * g.reshape(1, -1, 1, 1, 1) + b.reshape(1, -1, 1, 1, 1))


def resblock_ref(x, params, stride=1):
    cin, cout = x.shape[1], params["w1"].shape[0]
    has_down = (stride > 1) or (cin != cout)
    h = _conv3d_ref(x, params["w1"], stride, 1)
    h = jnp.maximum(h, 0.0)
    h = _bn_ref(h, params["g1"], params["b1"])
    h = _conv3d_ref(h, params["w2"], 1, 1)
    h = _bn_ref(h, params["g2"], params["b2"])
    if has_down:
        r = _conv3d_ref(x, params["wd"], stride, 0)
        r = _bn_ref(r, params["gd"], params["bd"])
    else:
        r = x
    return jnp.maximum(h + r, 0.0)


def _make_params(key, cin, cout):
    ks = jax.random.split(key, 9)
    return {
        "w1": jax.random.normal(ks[0], (cout, cin, 3, 3, 3), jnp.float32) / np.sqrt(cin * 27),
        "g1": 1.0 + 0.1 * jax.random.normal(ks[1], (cout,), jnp.float32),
        "b1": 0.1 * jax.random.normal(ks[2], (cout,), jnp.float32),
        "w2": jax.random.normal(ks[3], (cout, cout, 3, 3, 3), jnp.float32) / np.sqrt(cout * 27),
        "g2": 1.0 + 0.1 * jax.random.normal(ks[4], (cout,), jnp.float32),
        "b2": 0.1 * jax.random.normal(ks[5], (cout,), jnp.float32),
        "wd": jax.random.normal(ks[6], (cout, cin, 1, 1, 1), jnp.float32) / np.sqrt(cin),
        "gd": 1.0 + 0.1 * jax.random.normal(ks[7], (cout,), jnp.float32),
        "bd": 0.1 * jax.random.normal(ks[8], (cout,), jnp.float32),
    }


if __name__ == "__main__":
    # Two small configs covering both code paths:
    #  (1) c_in=4 -> c_out=8, stride=2  => down path (1x1 conv + BN) active
    #  (2) c_in=8 -> c_out=8, stride=1  => identity residual path
    configs = [
        (2, 4, 8, 8, 2),
        (4, 8, 8, 8, 1),
    ]
    key = jax.random.PRNGKey(0)
    for (N, Cin, Cout, S, stride) in configs:
        key, pk, xk = jax.random.split(key, 3)
        params = _make_params(pk, Cin, Cout)
        x = jax.random.normal(xk, (N, Cin, S, S, S), jnp.float32)

        fwd = jax.jit(lambda xx, p=params, s=stride: resblock_forward(xx, p, s))
        out = jax.block_until_ready(fwd(x))
        ref = jax.block_until_ready(resblock_ref(x, params, stride))

        # Tolerances sized for bf16 MXU operands in the two 3x3x3 conv GEMMs
        # (f32 accumulation, f32 BN statistics and residual path).
        np.testing.assert_allclose(np.asarray(out), np.asarray(ref),
                                   rtol=2e-2, atol=5e-2)
    print("KERNEL_OK")
</pallas_src>

<mosaic_0001>
module attributes {stable_mosaic.version = 11 : i64} {
  func.func @_conv_stats_kernel(%arg0: i32, %arg1: memref<8x108xbf16, #tpu.memory_space<vmem>>, %arg2: memref<108x128xbf16, #tpu.memory_space<vmem>>, %arg3: memref<8x128xbf16, #tpu.memory_space<vmem>>, %arg4: memref<1x8x1xf32, #tpu.memory_space<vmem>>, %arg5: memref<1x8x1xf32, #tpu.memory_space<vmem>>) attributes {dimension_semantics = [#tpu.dimension_semantics<parallel>], iteration_bounds = array<i64: 1>, scalar_prefetch = 0 : i64, scratch_operands = 0 : i64, tpu.core_type = #tpu.core_type<tc>, window_params = [{pipeline_mode = #tpu.pipeline_mode<synchronous>, transform_indices = @transform_0, window_bounds = array<i64: 8, 108>}, {transform_indices = @transform_1, window_bounds = array<i64: 108, 128>}, {transform_indices = @transform_2, window_bounds = array<i64: 8, 128>}, {transform_indices = @transform_3, window_bounds = array<i64: 1, 8, 1>}, {transform_indices = @transform_4, window_bounds = array<i64: 1, 8, 1>}]} {
    %c0 = arith.constant 0 : index
    %c0_0 = arith.constant 0 : index
    %0 = vector.load %arg1[%c0, %c0_0] : memref<8x108xbf16, #tpu.memory_space<vmem>>, vector<8x108xbf16>
    %c0_1 = arith.constant 0 : index
    %c0_2 = arith.constant 0 : index
    %1 = vector.load %arg2[%c0_1, %c0_2] : memref<108x128xbf16, #tpu.memory_space<vmem>>, vector<108x128xbf16>
    %cst = arith.constant dense<0.000000e+00> : vector<8x128xf32>
    %2 = tpu.matmul %0, %1, %cst {dimension_numbers = #tpu.dot_dimension_numbers<[1], [0], [0], [1], [0, 0, 1, 1], [], []>} : vector<8x108xbf16>, vector<108x128xbf16>, vector<8x128xf32> -> vector<8x128xf32>
    %cst_3 = arith.constant 0.000000e+00 : f32
    %3 = vector.broadcast %cst_3 : f32 to vector<8x128xf32>
    %4 = arith.maximumf %2, %3 : vector<8x128xf32>
    %5 = arith.truncf %4 : vector<8x128xf32> to vector<8x128xbf16>
    %c0_4 = arith.constant 0 : index
    %c0_5 = arith.constant 0 : index
    %6 = vector.load %arg3[%c0_4, %c0_5] : memref<8x128xbf16, #tpu.memory_space<vmem>>, vector<8x128xbf16>
    tpu.vector_store %arg3[%c0_4, %c0_5], %5 {strides = array<i32>} : memref<8x128xbf16, #tpu.memory_space<vmem>>, vector<8x128xbf16>,
    %cst_6 = arith.constant dense<0.000000e+00> : vector<8xf32>
    %7 = vector.multi_reduction <add>, %4, %cst_6 [1] : vector<8x128xf32> to vector<8xf32>
    %8 = vector.shape_cast %7 : vector<8xf32> to vector<8x1xf32>
    %c0_7 = arith.constant 0 : index
    %c0_8 = arith.constant 0 : index
    %c0_9 = arith.constant 0 : index
    %9 = vector.load %arg4[%c0_7, %c0_8, %c0_9] : memref<1x8x1xf32, #tpu.memory_space<vmem>>, vector<1x8x1xf32>
    %10 = vector.shape_cast %9 : vector<1x8x1xf32> to vector<8x1xf32>
    %11 = vector.shape_cast %8 : vector<8x1xf32> to vector<1x8x1xf32>
    tpu.vector_store %arg4[%c0_7, %c0_8, %c0_9], %11 {strides = array<i32>} : memref<1x8x1xf32, #tpu.memory_space<vmem>>, vector<1x8x1xf32>,
    %12 = arith.mulf %4, %4 : vector<8x128xf32>
    %cst_10 = arith.constant dense<0.000000e+00> : vector<8xf32>
    %13 = vector.multi_reduction <add>, %12, %cst_10 [1] : vector<8x128xf32> to vector<8xf32>
    %14 = vector.shape_cast %13 : vector<8xf32> to vector<8x1xf32>
    %c0_11 = arith.constant 0 : index
    %c0_12 = arith.constant 0 : index
    %c0_13 = arith.constant 0 : index
    %15 = vector.load %arg5[%c0_11, %c0_12, %c0_13] : memref<1x8x1xf32, #tpu.memory_space<vmem>>, vector<1x8x1xf32>
    %16 = vector.shape_cast %15 : vector<1x8x1xf32> to vector<8x1xf32>
    %17 = vector.shape_cast %14 : vector<8x1xf32> to vector<1x8x1xf32>
    tpu.vector_store %arg5[%c0_11, %c0_12, %c0_13], %17 {strides = array<i32>} : memref<1x8x1xf32, #tpu.memory_space<vmem>>, vector<1x8x1xf32>,
    return
  }
  func.func @transform_0(%arg0: i32) -> (i32, i32) {
    %c0_i32 = arith.constant 0 : i32
    %c0_i32_0 = arith.constant 0 : i32
    %c0_i32_1 = arith.constant 0 : i32
    return %c0_i32, %c0_i32_0 : i32, i32
  }
  func.func @transform_1(%arg0: i32) -> (i32, i32) {
    %c0_i32 = arith.constant 0 : i32
    %c0_i32_0 = arith.constant 0 : i32
    return %c0_i32, %arg0 : i32, i32
  }
  func.func @transform_2(%arg0: i32) -> (i32, i32) {
    %c0_i32 = arith.constant 0 : i32
    %c0_i32_0 = arith.constant 0 : i32
    return %c0_i32, %arg0 : i32, i32
  }
  func.func @transform_3(%arg0: i32) -> (i32, i32, i32) {
    %c0_i32 = arith.constant 0 : i32
    %c0_i32_0 = arith.constant 0 : i32
    %c0_i32_1 = arith.constant 0 : i32
    return %arg0, %c0_i32, %c0_i32_0 : i32, i32, i32
  }
  func.func @transform_4(%arg0: i32) -> (i32, i32, i32) {
    %c0_i32 = arith.constant 0 : i32
    %c0_i32_0 = arith.constant 0 : i32
    %c0_i32_1 = arith.constant 0 : i32
    return %arg0, %c0_i32, %c0_i32_0 : i32, i32, i32
  }
}

module attributes {stable_mosaic.version = 11 : i64} {
  func.func @_affine_kernel(%arg0: i32, %arg1: memref<8x128xbf16, #tpu.memory_space<vmem>>, %arg2: memref<8x1xf32, #tpu.memory_space<vmem>>, %arg3: memref<8x1xf32, #tpu.memory_space<vmem>>, %arg4: memref<8x128xbf16, #tpu.memory_space<vmem>>) attributes {dimension_semantics = [#tpu.dimension_semantics<parallel>], iteration_bounds = array<i64: 1>, scalar_prefetch = 0 : i64, scratch_operands = 0 : i64, tpu.core_type = #tpu.core_type<tc>, window_params = [{transform_indices = @transform_0, window_bounds = array<i64: 8, 128>}, {pipeline_mode = #tpu.pipeline_mode<synchronous>, transform_indices = @transform_1, window_bounds = array<i64: 8, 1>}, {pipeline_mode = #tpu.pipeline_mode<synchronous>, transform_indices = @transform_2, window_bounds = array<i64: 8, 1>}, {transform_indices = @transform_3, window_bounds = array<i64: 8, 128>}]} {
    %c0 = arith.constant 0 : index
    %c0_0 = arith.constant 0 : index
    %0 = vector.load %arg1[%c0, %c0_0] : memref<8x128xbf16, #tpu.memory_space<vmem>>, vector<8x128xbf16>
    %1 = arith.extf %0 : vector<8x128xbf16> to vector<8x128xf32>
    %c0_1 = arith.constant 0 : index
    %c0_2 = arith.constant 0 : index
    %2 = vector.load %arg2[%c0_1, %c0_2] : memref<8x1xf32, #tpu.memory_space<vmem>>, vector<8x1xf32>
    %3 = vector.broadcast %2 : vector<8x1xf32> to vector<8x128xf32>
    %4 = arith.mulf %1, %3 : vector<8x128xf32>
    %c0_3 = arith.constant 0 : index
    %c0_4 = arith.constant 0 : index
    %5 = vector.load %arg3[%c0_3, %c0_4] : memref<8x1xf32, #tpu.memory_space<vmem>>, vector<8x1xf32>
    %6 = vector.broadcast %5 : vector<8x1xf32> to vector<8x128xf32>
    %7 = arith.addf %4, %6 : vector<8x128xf32>
    %8 = arith.truncf %7 : vector<8x128xf32> to vector<8x128xbf16>
    %c0_5 = arith.constant 0 : index
    %c0_6 = arith.constant 0 : index
    %9 = vector.load %arg4[%c0_5, %c0_6] : memref<8x128xbf16, #tpu.memory_space<vmem>>, vector<8x128xbf16>
    tpu.vector_store %arg4[%c0_5, %c0_6], %8 {strides = array<i32>} : memref<8x128xbf16, #tpu.memory_space<vmem>>, vector<8x128xbf16>,
    return
  }
  func.func @transform_0(%arg0: i32) -> (i32, i32) {
    %c0_i32 = arith.constant 0 : i32
    %c0_i32_0 = arith.constant 0 : i32
    return %c0_i32, %arg0 : i32, i32
  }
  func.func @transform_1(%arg0: i32) -> (i32, i32) {
    %c0_i32 = arith.constant 0 : i32
    %c0_i32_0 = arith.constant 0 : i32
    %c0_i32_1 = arith.constant 0 : i32
    return %c0_i32, %c0_i32_0 : i32, i32
  }
  func.func @transform_2(%arg0: i32) -> (i32, i32) {
    %c0_i32 = arith.constant 0 : i32
    %c0_i32_0 = arith.constant 0 : i32
    %c0_i32_1 = arith.constant 0 : i32
    return %c0_i32, %c0_i32_0 : i32, i32
  }
  func.func @transform_3(%arg0: i32) -> (i32, i32) {
    %c0_i32 = arith.constant 0 : i32
    %c0_i32_0 = arith.constant 0 : i32
    return %c0_i32, %arg0 : i32, i32
  }
}

module attributes {stable_mosaic.version = 11 : i64} {
  func.func @_finalize_down_kernel(%arg0: i32, %arg1: memref<8x128xf32, #tpu.memory_space<vmem>>, %arg2: memref<8x128xf32, #tpu.memory_space<vmem>>, %arg3: memref<8x1xf32, #tpu.memory_space<vmem>>, %arg4: memref<8x1xf32, #tpu.memory_space<vmem>>, %arg5: memref<8x1xf32, #tpu.memory_space<vmem>>, %arg6: memref<8x1xf32, #tpu.memory_space<vmem>>, %arg7: memref<8x128xf32, #tpu.memory_space<vmem>>) attributes {dimension_semantics = [#tpu.dimension_semantics<parallel>], iteration_bounds = array<i64: 1>, scalar_prefetch = 0 : i64, scratch_operands = 0 : i64, tpu.core_type = #tpu.core_type<tc>, window_params = [{transform_indices = @transform_0, window_bounds = array<i64: 8, 128>}, {transform_indices = @transform_1, window_bounds = array<i64: 8, 128>}, {pipeline_mode = #tpu.pipeline_mode<synchronous>, transform_indices = @transform_2, window_bounds = array<i64: 8, 1>}, {pipeline_mode = #tpu.pipeline_mode<synchronous>, transform_indices = @transform_3, window_bounds = array<i64: 8, 1>}, {pipeline_mode = #tpu.pipeline_mode<synchronous>, transform_indices = @transform_4, window_bounds = array<i64: 8, 1>}, {pipeline_mode = #tpu.pipeline_mode<synchronous>, transform_indices = @transform_5, window_bounds = array<i64: 8, 1>}, {transform_indices = @transform_6, window_bounds = array<i64: 8, 128>}]} {
    %c0 = arith.constant 0 : index
    %c0_0 = arith.constant 0 : index
    %0 = vector.load %arg1[%c0, %c0_0] : memref<8x128xf32, #tpu.memory_space<vmem>>, vector<8x128xf32>
    %c0_1 = arith.constant 0 : index
    %c0_2 = arith.constant 0 : index
    %1 = vector.load %arg3[%c0_1, %c0_2] : memref<8x1xf32, #tpu.memory_space<vmem>>, vector<8x1xf32>
    %2 = vector.broadcast %1 : vector<8x1xf32> to vector<8x128xf32>
    %3 = arith.mulf %0, %2 : vector<8x128xf32>
    %c0_3 = arith.constant 0 : index
    %c0_4 = arith.constant 0 : index
    %4 = vector.load %arg4[%c0_3, %c0_4] : memref<8x1xf32, #tpu.memory_space<vmem>>, vector<8x1xf32>
    %5 = vector.broadcast %4 : vector<8x1xf32> to vector<8x128xf32>
    %6 = arith.addf %3, %5 : vector<8x128xf32>
    %c0_5 = arith.constant 0 : index
    %c0_6 = arith.constant 0 : index
    %7 = vector.load %arg2[%c0_5, %c0_6] : memref<8x128xf32, #tpu.memory_space<vmem>>, vector<8x128xf32>
    %c0_7 = arith.constant 0 : index
    %c0_8 = arith.constant 0 : index
    %8 = vector.load %arg5[%c0_7, %c0_8] : memref<8x1xf32, #tpu.memory_space<vmem>>, vector<8x1xf32>
    %9 = vector.broadcast %8 : vector<8x1xf32> to vector<8x128xf32>
    %10 = arith.mulf %7, %9 : vector<8x128xf32>
    %c0_9 = arith.constant 0 : index
    %c0_10 = arith.constant 0 : index
    %11 = vector.load %arg6[%c0_9, %c0_10] : memref<8x1xf32, #tpu.memory_space<vmem>>, vector<8x1xf32>
    %12 = vector.broadcast %11 : vector<8x1xf32> to vector<8x128xf32>
    %13 = arith.addf %10, %12 : vector<8x128xf32>
    %14 = arith.addf %6, %13 : vector<8x128xf32>
    %cst = arith.constant 0.000000e+00 : f32
    %15 = vector.broadcast %cst : f32 to vector<8x128xf32>
    %16 = arith.maximumf %14, %15 : vector<8x128xf32>
    %c0_11 = arith.constant 0 : index
    %c0_12 = arith.constant 0 : index
    %17 = vector.load %arg7[%c0_11, %c0_12] : memref<8x128xf32, #tpu.memory_space<vmem>>, vector<8x128xf32>
    tpu.vector_store %arg7[%c0_11, %c0_12], %16 {strides = array<i32>} : memref<8x128xf32, #tpu.memory_space<vmem>>, vector<8x128xf32>,
    return
  }
  func.func @transform_0(%arg0: i32) -> (i32, i32) {
    %c0_i32 = arith.constant 0 : i32
    %c0_i32_0 = arith.constant 0 : i32
    return %c0_i32, %arg0 : i32, i32
  }
  func.func @transform_1(%arg0: i32) -> (i32, i32) {
    %c0_i32 = arith.constant 0 : i32
    %c0_i32_0 = arith.constant 0 : i32
    return %c0_i32, %arg0 : i32, i32
  }
  func.func @transform_2(%arg0: i32) -> (i32, i32) {
    %c0_i32 = arith.constant 0 : i32
    %c0_i32_0 = arith.constant 0 : i32
    %c0_i32_1 = arith.constant 0 : i32
    return %c0_i32, %c0_i32_0 : i32, i32
  }
  func.func @transform_3(%arg0: i32) -> (i32, i32) {
    %c0_i32 = arith.constant 0 : i32
    %c0_i32_0 = arith.constant 0 : i32
    %c0_i32_1 = arith.constant 0 : i32
    return %c0_i32, %c0_i32_0 : i32, i32
  }
  func.func @transform_4(%arg0: i32) -> (i32, i32) {
    %c0_i32 = arith.constant 0 : i32
    %c0_i32_0 = arith.constant 0 : i32
    %c0_i32_1 = arith.constant 0 : i32
    return %c0_i32, %c0_i32_0 : i32, i32
  }
  func.func @transform_5(%arg0: i32) -> (i32, i32) {
    %c0_i32 = arith.constant 0 : i32
    %c0_i32_0 = arith.constant 0 : i32
    %c0_i32_1 = arith.constant 0 : i32
    return %c0_i32, %c0_i32_0 : i32, i32
  }
  func.func @transform_6(%arg0: i32) -> (i32, i32) {
    %c0_i32 = arith.constant 0 : i32
    %c0_i32_0 = arith.constant 0 : i32
    return %c0_i32, %arg0 : i32, i32
  }
}

module attributes {stable_mosaic.version = 11 : i64} {
  func.func @_conv2_down_kernel(%arg0: i32, %arg1: memref<8x216xbf16, #tpu.memory_space<vmem>>, %arg2: memref<216x128xbf16, #tpu.memory_space<vmem>>, %arg3: memref<8x4xf32, #tpu.memory_space<vmem>>, %arg4: memref<4x128xf32, #tpu.memory_space<vmem>>, %arg5: memref<8x128xf32, #tpu.memory_space<vmem>>, %arg6: memref<1x8x1xf32, #tpu.memory_space<vmem>>, %arg7: memref<1x8x1xf32, #tpu.memory_space<vmem>>, %arg8: memref<8x128xf32, #tpu.memory_space<vmem>>, %arg9: memref<1x8x1xf32, #tpu.memory_space<vmem>>, %arg10: memref<1x8x1xf32, #tpu.memory_space<vmem>>) attributes {dimension_semantics = [#tpu.dimension_semantics<parallel>], iteration_bounds = array<i64: 1>, scalar_prefetch = 0 : i64, scratch_operands = 0 : i64, tpu.core_type = #tpu.core_type<tc>, window_params = [{pipeline_mode = #tpu.pipeline_mode<synchronous>, transform_indices = @transform_0, window_bounds = array<i64: 8, 216>}, {transform_indices = @transform_1, window_bounds = array<i64: 216, 128>}, {pipeline_mode = #tpu.pipeline_mode<synchronous>, transform_indices = @transform_2, window_bounds = array<i64: 8, 4>}, {transform_indices = @transform_3, window_bounds = array<i64: 4, 128>}, {transform_indices = @transform_4, window_bounds = array<i64: 8, 128>}, {transform_indices = @transform_5, window_bounds = array<i64: 1, 8, 1>}, {transform_indices = @transform_6, window_bounds = array<i64: 1, 8, 1>}, {transform_indices = @transform_7, window_bounds = array<i64: 8, 128>}, {transform_indices = @transform_8, window_bounds = array<i64: 1, 8, 1>}, {transform_indices = @transform_9, window_bounds = array<i64: 1, 8, 1>}]} {
    %c0 = arith.constant 0 : index
    %c0_0 = arith.constant 0 : index
    %0 = vector.load %arg1[%c0, %c0_0] : memref<8x216xbf16, #tpu.memory_space<vmem>>, vector<8x216xbf16>
    %c0_1 = arith.constant 0 : index
    %c0_2 = arith.constant 0 : index
    %1 = vector.load %arg2[%c0_1, %c0_2] : memref<216x128xbf16, #tpu.memory_space<vmem>>, vector<216x128xbf16>
    %cst = arith.constant dense<0.000000e+00> : vector<8x128xf32>
    %2 = tpu.matmul %0, %1, %cst {dimension_numbers = #tpu.dot_dimension_numbers<[1], [0], [0], [1], [0, 0, 1, 1], [], []>} : vector<8x216xbf16>, vector<216x128xbf16>, vector<8x128xf32> -> vector<8x128xf32>
    %c0_3 = arith.constant 0 : index
    %c0_4 = arith.constant 0 : index
    %3 = vector.load %arg5[%c0_3, %c0_4] : memref<8x128xf32, #tpu.memory_space<vmem>>, vector<8x128xf32>
    tpu.vector_store %arg5[%c0_3, %c0_4], %2 {strides = array<i32>} : memref<8x128xf32, #tpu.memory_space<vmem>>, vector<8x128xf32>,
    %cst_5 = arith.constant dense<0.000000e+00> : vector<8xf32>
    %4 = vector.multi_reduction <add>, %2, %cst_5 [1] : vector<8x128xf32> to vector<8xf32>
    %5 = vector.shape_cast %4 : vector<8xf32> to vector<8x1xf32>
    %c0_6 = arith.constant 0 : index
    %c0_7 = arith.constant 0 : index
    %c0_8 = arith.constant 0 : index
    %6 = vector.load %arg6[%c0_6, %c0_7, %c0_8] : memref<1x8x1xf32, #tpu.memory_space<vmem>>, vector<1x8x1xf32>
    %7 = vector.shape_cast %6 : vector<1x8x1xf32> to vector<8x1xf32>
    %8 = vector.shape_cast %5 : vector<8x1xf32> to vector<1x8x1xf32>
    tpu.vector_store %arg6[%c0_6, %c0_7, %c0_8], %8 {strides = array<i32>} : memref<1x8x1xf32, #tpu.memory_space<vmem>>, vector<1x8x1xf32>,
    %9 = arith.mulf %2, %2 : vector<8x128xf32>
    %cst_9 = arith.constant dense<0.000000e+00> : vector<8xf32>
    %10 = vector.multi_reduction <add>, %9, %cst_9 [1] : vector<8x128xf32> to vector<8xf32>
    %11 = vector.shape_cast %10 : vector<8xf32> to vector<8x1xf32>
    %c0_10 = arith.constant 0 : index
    %c0_11 = arith.constant 0 : index
    %c0_12 = arith.constant 0 : index
    %12 = vector.load %arg7[%c0_10, %c0_11, %c0_12] : memref<1x8x1xf32, #tpu.memory_space<vmem>>, vector<1x8x1xf32>
    %13 = vector.shape_cast %12 : vector<1x8x1xf32> to vector<8x1xf32>
    %14 = vector.shape_cast %11 : vector<8x1xf32> to vector<1x8x1xf32>
    tpu.vector_store %arg7[%c0_10, %c0_11, %c0_12], %14 {strides = array<i32>} : memref<1x8x1xf32, #tpu.memory_space<vmem>>, vector<1x8x1xf32>,
    %c0_13 = arith.constant 0 : index
    %c0_14 = arith.constant 0 : index
    %15 = vector.load %arg3[%c0_13, %c0_14] : memref<8x4xf32, #tpu.memory_space<vmem>>, vector<8x4xf32>
    %c0_15 = arith.constant 0 : index
    %c0_16 = arith.constant 0 : index
    %16 = vector.load %arg4[%c0_15, %c0_16] : memref<4x128xf32, #tpu.memory_space<vmem>>, vector<4x128xf32>
    %cst_17 = arith.constant dense<0.000000e+00> : vector<8x128xf32>
    %17 = tpu.matmul %15, %16, %cst_17 {dimension_numbers = #tpu.dot_dimension_numbers<[1], [0], [0], [1], [0, 0, 1, 1], [], []>} : vector<8x4xf32>, vector<4x128xf32>, vector<8x128xf32> -> vector<8x128xf32>
    %c0_18 = arith.constant 0 : index
    %c0_19 = arith.constant 0 : index
    %18 = vector.load %arg8[%c0_18, %c0_19] : memref<8x128xf32, #tpu.memory_space<vmem>>, vector<8x128xf32>
    tpu.vector_store %arg8[%c0_18, %c0_19], %17 {strides = array<i32>} : memref<8x128xf32, #tpu.memory_space<vmem>>, vector<8x128xf32>,
    %cst_20 = arith.constant dense<0.000000e+00> : vector<8xf32>
    %19 = vector.multi_reduction <add>, %17, %cst_20 [1] : vector<8x128xf32> to vector<8xf32>
    %20 = vector.shape_cast %19 : vector<8xf32> to vector<8x1xf32>
    %c0_21 = arith.constant 0 : index
    %c0_22 = arith.constant 0 : index
    %c0_23 = arith.constant 0 : index
    %21 = vector.load %arg9[%c0_21, %c0_22, %c0_23] : memref<1x8x1xf32, #tpu.memory_space<vmem>>, vector<1x8x1xf32>
    %22 = vector.shape_cast %21 : vector<1x8x1xf32> to vector<8x1xf32>
    %23 = vector.shape_cast %20 : vector<8x1xf32> to vector<1x8x1xf32>
    tpu.vector_store %arg9[%c0_21, %c0_22, %c0_23], %23 {strides = array<i32>} : memref<1x8x1xf32, #tpu.memory_space<vmem>>, vector<1x8x1xf32>,
    %24 = arith.mulf %17, %17 : vector<8x128xf32>
    %cst_24 = arith.constant dense<0.000000e+00> : vector<8xf32>
    %25 = vector.multi_reduction <add>, %24, %cst_24 [1] : vector<8x128xf32> to vector<8xf32>
    %26 = vector.shape_cast %25 : vector<8xf32> to vector<8x1xf32>
    %c0_25 = arith.constant 0 : index
    %c0_26 = arith.constant 0 : index
    %c0_27 = arith.constant 0 : index
    %27 = vector.load %arg10[%c0_25, %c0_26, %c0_27] : memref<1x8x1xf32, #tpu.memory_space<vmem>>, vector<1x8x1xf32>
    %28 = vector.shape_cast %27 : vector<1x8x1xf32> to vector<8x1xf32>
    %29 = vector.shape_cast %26 : vector<8x1xf32> to vector<1x8x1xf32>
    tpu.vector_store %arg10[%c0_25, %c0_26, %c0_27], %29 {strides = array<i32>} : memref<1x8x1xf32, #tpu.memory_space<vmem>>, vector<1x8x1xf32>,
    return
  }
  func.func @transform_0(%arg0: i32) -> (i32, i32) {
    %c0_i32 = arith.constant 0 : i32
    %c0_i32_0 = arith.constant 0 : i32
    %c0_i32_1 = arith.constant 0 : i32
    return %c0_i32, %c0_i32_0 : i32, i32
  }
  func.func @transform_1(%arg0: i32) -> (i32, i32) {
    %c0_i32 = arith.constant 0 : i32
    %c0_i32_0 = arith.constant 0 : i32
    return %c0_i32, %arg0 : i32, i32
  }
  func.func @transform_2(%arg0: i32) -> (i32, i32) {
    %c0_i32 = arith.constant 0 : i32
    %c0_i32_0 = arith.constant 0 : i32
    %c0_i32_1 = arith.constant 0 : i32
    return %c0_i32, %c0_i32_0 : i32, i32
  }
  func.func @transform_3(%arg0: i32) -> (i32, i32) {
    %c0_i32 = arith.constant 0 : i32
    %c0_i32_0 = arith.constant 0 : i32
    return %c0_i32, %arg0 : i32, i32
  }
  func.func @transform_4(%arg0: i32) -> (i32, i32) {
    %c0_i32 = arith.constant 0 : i32
    %c0_i32_0 = arith.constant 0 : i32
    return %c0_i32, %arg0 : i32, i32
  }
  func.func @transform_5(%arg0: i32) -> (i32, i32, i32) {
    %c0_i32 = arith.constant 0 : i32
    %c0_i32_0 = arith.constant 0 : i32
    %c0_i32_1 = arith.constant 0 : i32
    return %arg0, %c0_i32, %c0_i32_0 : i32, i32, i32
  }
  func.func @transform_6(%arg0: i32) -> (i32, i32, i32) {
    %c0_i32 = arith.constant 0 : i32
    %c0_i32_0 = arith.constant 0 : i32
    %c0_i32_1 = arith.constant 0 : i32
    return %arg0, %c0_i32, %c0_i32_0 : i32, i32, i32
  }
  func.func @transform_7(%arg0: i32) -> (i32, i32) {
    %c0_i32 = arith.constant 0 : i32
    %c0_i32_0 = arith.constant 0 : i32
    return %c0_i32, %arg0 : i32, i32
  }
  func.func @transform_8(%arg0: i32) -> (i32, i32, i32) {
    %c0_i32 = arith.constant 0 : i32
    %c0_i32_0 = arith.constant 0 : i32
    %c0_i32_1 = arith.constant 0 : i32
    return %arg0, %c0_i32, %c0_i32_0 : i32, i32, i32
  }
  func.func @transform_9(%arg0: i32) -> (i32, i32, i32) {
    %c0_i32 = arith.constant 0 : i32
    %c0_i32_0 = arith.constant 0 : i32
    %c0_i32_1 = arith.constant 0 : i32
    return %arg0, %c0_i32, %c0_i32_0 : i32, i32, i32
  }
}

</mosaic_0001>

<bundles_post_ra>
// kernel: _lambda_.5
= control target key start
LH: loop header
LB: loop body
LE: loop exit
PB: predicated region body
PF: predicated region fallthrough
CT: control target
= control target key end

     0   :  { %v38_v0 = vmov 0   ;;  %s71_s1 = inlined_call_operand.vmem [shape: f32[8,1], index: 1, kind: input, shape index: {}]   ;;  %s72_s2 = inlined_call_operand.vmem [shape: f32[8,1], index: 2, kind: input, shape index: {}]   ;;  %s73_s0 = inlined_call_operand.vmem [shape: bf16[8,128], index: 0, kind: input, shape index: {}]   ;;  %s74_s3 = inlined_call_operand.vmem [shape: bf16[8,128], index: 3, kind: output, shape index: {}]  }
   0x1   :  { %37 = vset.pattern.permute.xlu0 %v38_v0  ;;  %v16_v1 = vld [vmem:[%s71_s1] sm:$0xff] }
   0x2   :  { %19 = vperm.xlu0 %37, %v16_v1   ;;  %v23_v2 = vld [vmem:[%s72_s2] sm:$0xff] }
   0x3   :  { %v14_v3 = vld [vmem:[%s73_s0] sm:$0xf] }
   0x4   :  { %v15_v4 = vunpack.c.l.bf16 %v14_v3 }
   0x6   :  { %26 = vperm.xlu0 %37, %v23_v2  }
  0x7d   :  { %v20_v5 = vpop.permute.xlu0 %19 }
  0x7e   :  { %v22_v6 = vmul.f32 %v20_v5, %v15_v4 }
  0x81   :  { %v27_v7 = vpop.permute.xlu0 %26 }
  0x82   :  { %v29_v8 = vadd.f32 %v27_v7, %v22_v6 }
  0x84   :  { %v30_v9 = vpack.c.bf16 %v29_v8, %v29_v8 }
  0x86   :  { %31 = vst [vmem:[%s74_s3] sm:$0xf] %v30_v9 }

// kernel: _lambda_.4
= control target key start
LH: loop header
LB: loop body
LE: loop exit
PB: predicated region body
PF: predicated region fallthrough
CT: control target
= control target key end

     0   :  { %vm75_vm0 = vcmask 1045504   ;;  %v185_v0 = vmov 0.0   ;;  %vm186_vm1 = vmmov 0   ;;  %vm71_vm2 = vcmask 883712   ;;  %s245_s1 = inlined_call_operand.vmem [shape: bf16[108,128], index: 1, kind: input, shape index: {}]   ;;  %s246_s0 = inlined_call_operand.vmem [shape: bf16[8,108], index: 0, kind: input, shape index: {}]   ;;  %s247_s2 = inlined_call_operand.vmem [shape: bf16[8,128], index: 2, kind: output, shape index: {0}]   ;;  %s248_s3 = inlined_call_operand.vmem [shape: f32[1,8,1], index: 3, kind: output, shape index: {1}]   ;;  %s249_s4 = inlined_call_operand.vmem [shape: f32[1,8,1], index: 4, kind: output, shape index: {2}]  }
   0x1   :  { %158 = vmatprep.subr.bf16.mxu0 %v185_v0  ;;  %v178_v1 = vld [vmem:[%s245_s1 + $0x30] sm:$0x3f]   ;;  %172 = vmatprep.mubr.msk.bf16.mxu0 %vm186_vm1, %v185_v0  ;;  %v179_v3 = vld [vmem:[%s245_s1 + $0x28] sm:$0xff]   ;;  %v180_v4 = vld [vmem:[%s245_s1 + $0x20] sm:$0xff]   ;;  %vm124_vm3 = vcmask 7168  }
   0x2   :  { %v77_v2 = vsel %vm75_vm0, %v178_v1, 0  ;;  %v181_v5 = vld [vmem:[%s245_s1 + $0x18] sm:$0xff]   ;;  %v182_v6 = vld [vmem:[%s245_s1 + $0x10] sm:$0xff]   ;;  %v183_v7 = vld [vmem:[%s245_s1 + $0x8] sm:$0xff]  }
   0x3   :  { %159 = vmatpush3.bf16.msra.mxu0 %v77_v2  ;;  %v184_v8 = vld [vmem:[%s245_s1] sm:$0xff]  }
   0x4   :  { %160 = vmatprep.subr.bf16.mxu0 %v185_v0  ;;  %v15_v9 = vld [vmem:[%s246_s0] sm:$0xf] }
   0x7   :  { %161 = vmatpush3.bf16.msra.mxu0 %v179_v3 }
   0x8   :  { %162 = vmatprep.subr.bf16.mxu0 %v185_v0 }
   0xb   :  { %163 = vmatpush3.bf16.msra.mxu0 %v180_v4 }
   0xc   :  { %164 = vmatprep.subr.bf16.mxu0 %v185_v0 }
   0xf   :  { %165 = vmatpush3.bf16.msra.mxu0 %v181_v5 }
  0x10   :  { %166 = vmatprep.subr.bf16.mxu0 %v185_v0 }
  0x13   :  { %167 = vmatpush3.bf16.msra.mxu0 %v182_v6 }
  0x14   :  { %168 = vmatprep.subr.bf16.mxu0 %v185_v0 }
  0x17   :  { %169 = vmatpush3.bf16.msra.mxu0 %v183_v7 }
  0x18   :  { %170 = vmatprep.subr.bf16.mxu0 %v185_v0 }
  0x1b   :  { %171 = vmatpush3.bf16.msra.mxu0 %v184_v8 }
  0x1e   :  { %173 = vmatmul.mubr.msk.bf16.vlgmr.msra.gmra.mxu0 %vm71_vm2, %v15_v9 }
  0xde   :  { %v113_v10 = vpop.f32.mrf.mxu0 }
  0xdf   :  { %v119_v11 = vmax.f32 %v113_v10, 0.0 }
  0xe0   :  { %v174_v12 = vpop.f32.mrf.mxu0 }
  0xe1   :  { %v120_v13 = vpack.c.bf16 %v119_v11, %v119_v11  ;;  %122 = vadd.xlane.f32.xlu0 %v119_v11  ;;  %v126_v15 = vmul.f32 %v119_v11, %v119_v11 }
  0xe2   :  { %v116_v14 = vpop.f32.mrf.mxu0 }
  0xe3   :  { %121 = vst [vmem:[%s247_s2] sm:$0xf] %v120_v13 }
  0xe4   :  { %v175_v16 = vpop.f32.mrf.mxu0 }
  0xe5   :  { %127 = vadd.xlane.f32.xlu0 %v126_v15 }
 0x16a   :  { %v123_v17 = vpop.xlane.xlu0 %122 }
 0x16b   :  { %125 = vst.msk [vmem:[%s248_s3] sm:$0xff] %vm124_vm3, %v123_v17 }
 0x16e   :  { %v128_v18 = vpop.xlane.xlu0 %127 }
 0x16f   :  { %129 = vst.msk [vmem:[%s249_s4] sm:$0xff] %vm124_vm3, %v128_v18 }

// kernel: _lambda_.7
= control target key start
LH: loop header
LB: loop body
LE: loop exit
PB: predicated region body
PF: predicated region fallthrough
CT: control target
= control target key end

     0   :  { %v63_v0 = vmov 0   ;;  %s120_s3 = inlined_call_operand.vmem [shape: f32[8,1], index: 3, kind: input, shape index: {}]   ;;  %s121_s2 = inlined_call_operand.vmem [shape: f32[8,1], index: 2, kind: input, shape index: {}]   ;;  %s122_s5 = inlined_call_operand.vmem [shape: f32[8,1], index: 5, kind: input, shape index: {}]   ;;  %s123_s4 = inlined_call_operand.vmem [shape: f32[8,1], index: 4, kind: input, shape index: {}]   ;;  %s124_s0 = inlined_call_operand.vmem [shape: f32[8,128], index: 0, kind: input, shape index: {}]   ;;  %s125_s1 = inlined_call_operand.vmem [shape: f32[8,128], index: 1, kind: input, shape index: {}]   ;;  %s126_s6 = inlined_call_operand.vmem [shape: f32[8,128], index: 6, kind: output, shape index: {}]  }
   0x1   :  { %62 = vset.pattern.permute.xlu1 %v63_v0  ;;  %61 = vset.pattern.permute.xlu0 %v63_v0  ;;  %v31_v1 = vld [vmem:[%s120_s3] sm:$0xff] }
   0x2   :  { %v24_v2 = vld [vmem:[%s121_s2] sm:$0xff]  ;;  %34 = vperm.xlu1 %62, %v31_v1  }
   0x3   :  { %27 = vperm.xlu0 %61, %v24_v2   ;;  %v46_v3 = vld [vmem:[%s122_s5] sm:$0xff] }
   0x4   :  { %v39_v4 = vld [vmem:[%s123_s4] sm:$0xff] }
   0x5   :  { %v23_v7 = vld [vmem:[%s124_s0] sm:$0xff] }
   0x6   :  { %49 = vperm.xlu1 %62, %v46_v3   ;;  %v38_v8 = vld [vmem:[%s125_s1] sm:$0xff] }
   0x7   :  { %42 = vperm.xlu0 %61, %v39_v4  }
  0x7d   :  { %v35_v5 = vpop.permute.xlu1 %34 }
  0x7e   :  { %v28_v6 = vpop.permute.xlu0 %27 }
  0x7f   :  { %v30_v9 = vmul.f32 %v28_v6, %v23_v7 }
  0x81   :  { %v50_v12 = vpop.permute.xlu1 %49  ;;  %v37_v13 = vadd.f32 %v35_v5, %v30_v9 }
  0x82   :  { %v43_v10 = vpop.permute.xlu0 %42 }
  0x83   :  { %v45_v11 = vmul.f32 %v43_v10, %v38_v8 }
  0x85   :  { %v52_v14 = vadd.f32 %v50_v12, %v45_v11 }
  0x87   :  { %v53_v15 = vadd.f32 %v52_v14, %v37_v13 }
  0x89   :  { %v54_v16 = vmax.f32 %v53_v15, 0.0 }
  0x8b   :  { %55 = vst [vmem:[%s126_s6] sm:$0xff] %v54_v16 }

// kernel: _lambda_.6
= control target key start
LH: loop header
LB: loop body
LE: loop exit
PB: predicated region body
PF: predicated region fallthrough
CT: control target
= control target key end

     0   :  { %v352_v0 = vmov 0   ;;  %v353_v2 = vmov 0.0   ;;  %vm354_vm0 = vmmov 0   ;;  %vm198_vm1 = vcmask 31744   ;;  %s476_s1 = inlined_call_operand.vmem [shape: bf16[216,128], index: 1, kind: input, shape index: {}]   ;;  %s477_s3 = inlined_call_operand.vmem [shape: f32[4,128], index: 3, kind: input, shape index: {}]   ;;  %s478_s2 = inlined_call_operand.vmem [shape: f32[8,4], index: 2, kind: input, shape index: {}]   ;;  %s479_s0 = inlined_call_operand.vmem [shape: bf16[8,216], index: 0, kind: input, shape index: {}]   ;;  %s480_s7 = inlined_call_operand.vmem [shape: f32[8,128], index: 7, kind: output, shape index: {3}]   ;;  %s481_s4 = inlined_call_operand.vmem [shape: f32[8,128], index: 4, kind: output, shape index: {0}]   ;;  %s482_s8 = inlined_call_operand.vmem [shape: f32[1,8,1], index: 8, kind: output, shape index: {4}]   ;;  %s483_s9 = inlined_call_operand.vmem [shape: f32[1,8,1], index: 9, kind: output, shape index: {5}]   ;;  %s484_s5 = inlined_call_operand.vmem [shape: f32[1,8,1], index: 5, kind: output, shape index: {1}]   ;;  %s485_s6 = inlined_call_operand.vmem [shape: f32[1,8,1], index: 6, kind: output, shape index: {2}]  }
   0x1   :  { %147 = vmatprep.subr.bf16.mxu0 %v352_v0  ;;  %v336_v1 = vld [vmem:[%s476_s1 + $0x38] sm:$0xff]   ;;  %328 = vmatprep.subr.mxu1 %v353_v2  ;;  %v337_v3 = vld [vmem:[%s476_s1 + $0x30] sm:$0xff]   ;;  %v338_v4 = vld [vmem:[%s476_s1 + $0x28] sm:$0xff]   ;;  %vm143_vm2 = vcmask 1043456   ;;  %vm139_vm3 = vcmask 719872   ;;  %vm190_vm4 = vcmask 7168  }
   0x2   :  { %330 = vmatprep.mubr.msk.f32.mxu1 %vm354_vm0, %v353_v2  ;;  %148 = vmatpush1.bf16.msra.mxu0 %v336_v1  ;;  %v339_v5 = vld [vmem:[%s476_s1 + $0x20] sm:$0xff]   ;;  %v340_v7 = vld [vmem:[%s476_s1 + $0x18] sm:$0xff]   ;;  %v341_v11 = vld [vmem:[%s476_s1 + $0x10] sm:$0xff]  }
   0x3   :  { %149 = vmatprep.subr.bf16.mxu0 %v352_v0  ;;  %v197_v6 = vld [vmem:[%s477_s3] sm:$0xf]  ;;  %v342_v12 = vld [vmem:[%s476_s1 + $0x8] sm:$0xff]   ;;  %v346_v17 = vld [vmem:[%s476_s1 + $0x58] sm:$0xff]  }
   0x4   :  { %329 = vmatpush3.msk.msra.mxu1 %vm143_vm2, %v197_v6  ;;  %v196_v8 = vld [vmem:[%s478_s2] sm:$0xff]  ;;  %v344_v14 = vld [vmem:[%s476_s1 + $0x68] ss:$0 sps:$4 sm:$0xff]   ;;  %v347_v18 = vld [vmem:[%s476_s1 + $0x50] sm:$0xff]  }
   0x5   :  { %v24_v9 = vld [vmem:[%s479_s0] sm:$0xff]  ;;  %331 = vmatmul.mubr.msk.f32.vlgmr.msra.gmra.mxu1 %vm198_vm1, %v196_v8  ;;  %v145_v15 = vsel %vm143_vm2, %v344_v14, 0  ;;  %v348_v19 = vld [vmem:[%s476_s1 + $0x48] sm:$0xff]  }
   0x6   :  { %150 = vmatpush1.bf16.msra.mxu0 %v337_v3  ;;  %v308_v10 = vcombine.high %v24_v9, %v24_v9  ;;  %v343_v13 = vld [vmem:[%s476_s1] sm:$0xff]   ;;  %v307_v21 = vcombine.low %v24_v9, %v24_v9 }
   0x7   :  { %151 = vmatprep.subr.bf16.mxu0 %v352_v0  ;;  %v345_v16 = vld [vmem:[%s476_s1 + $0x60] sm:$0xff]  }
   0x8   :  { %323 = vmatprep.mubr.msk.bf16.mxu0 %vm139_vm3, %v308_v10  ;;  %v349_v20 = vld [vmem:[%s476_s1 + $0x40] sm:$0xff]  }
   0xa   :  { %152 = vmatpush1.bf16.msra.mxu0 %v338_v4 }
   0xb   :  { %153 = vmatprep.subr.bf16.mxu0 %v352_v0 }
   0xe   :  { %154 = vmatpush1.bf16.msra.mxu0 %v339_v5 }
   0xf   :  { %155 = vmatprep.subr.bf16.mxu0 %v352_v0 }
  0x12   :  { %156 = vmatpush1.bf16.msra.mxu0 %v340_v7 }
  0x13   :  { %157 = vmatprep.subr.bf16.mxu0 %v352_v0 }
  0x16   :  { %158 = vmatpush1.bf16.msra.mxu0 %v341_v11 }
  0x17   :  { %159 = vmatprep.subr.bf16.mxu0 %v352_v0 }
  0x1a   :  { %160 = vmatpush1.bf16.msra.mxu0 %v342_v12 }
  0x1b   :  { %161 = vmatprep.subr.bf16.mxu0 %v352_v0 }
  0x1e   :  { %162 = vmatpush1.bf16.msra.mxu0 %v343_v13 }
  0x1f   :  { %167 = vmatprep.subr.bf16.mxu0 %v352_v0 }
  0x22   :  { %168 = vmatpush2.bf16.msra.mxu0 %v145_v15 }
  0x23   :  { %169 = vmatprep.subr.bf16.mxu0 %v352_v0 }
  0x26   :  { %170 = vmatpush2.bf16.msra.mxu0 %v345_v16 }
  0x27   :  { %171 = vmatprep.subr.bf16.mxu0 %v352_v0 }
  0x2a   :  { %172 = vmatpush2.bf16.msra.mxu0 %v346_v17 }
  0x2b   :  { %173 = vmatprep.subr.bf16.mxu0 %v352_v0 }
  0x2e   :  { %174 = vmatpush2.bf16.msra.mxu0 %v347_v18 }
  0x2f   :  { %175 = vmatprep.subr.bf16.mxu0 %v352_v0 }
  0x32   :  { %176 = vmatpush2.bf16.msra.mxu0 %v348_v19 }
  0x33   :  { %177 = vmatprep.subr.bf16.mxu0 %v352_v0 }
  0x36   :  { %178 = vmatpush2.bf16.msra.mxu0 %v349_v20 }
  0x39   :  { %180 = vmatmul.mubr.bf16.vlgmr.msra.gmra.mxu0 %v307_v21 }
  0xc5   :  { %v271_v22 = vpop.f32.mrf.mxu1 }
  0xc6   :  { %275 = vst [vmem:[%s480_s7] sm:$0xff] %v271_v22  ;;  %276 = vadd.xlane.f32.xlu1 %v271_v22  ;;  %v279_v23 = vmul.f32 %v271_v22, %v271_v22 }
  0xc7   :  { %v332_v24 = vpop.f32.mrf.mxu1 }
  0xca   :  { %280 = vadd.xlane.f32.xlu1 %v279_v23 }
  0xf9   :  { %v181_v25 = vpop.f32.mrf.mxu0 }
  0xfa   :  { %187 = vst [vmem:[%s481_s4] sm:$0xff] %v181_v25  ;;  %188 = vadd.xlane.f32.xlu0 %v181_v25  ;;  %v192_v27 = vmul.f32 %v181_v25, %v181_v25 }
  0xfb   :  { %v183_v26 = vpop.f32.mrf.mxu0 }
  0xfd   :  { %v184_v28 = vpop.f32.mrf.mxu0 }
  0xfe   :  { %193 = vadd.xlane.f32.xlu0 %v192_v27 }
  0xff   :  { %v185_v29 = vpop.f32.mrf.mxu0 }
 0x14f   :  { %v277_v30 = vpop.xlane.xlu1 %276 }
 0x150   :  { %278 = vst.msk [vmem:[%s482_s8] sm:$0xff] %vm190_vm4, %v277_v30 }
 0x153   :  { %v281_v31 = vpop.xlane.xlu1 %280 }
 0x154   :  { %282 = vst.msk [vmem:[%s483_s9] sm:$0xff] %vm190_vm4, %v281_v31 }
 0x183   :  { %v189_v32 = vpop.xlane.xlu0 %188 }
 0x184   :  { %191 = vst.msk [vmem:[%s484_s5] sm:$0xff] %vm190_vm4, %v189_v32 }
 0x187   :  { %v194_v33 = vpop.xlane.xlu0 %193 }
 0x188   :  { %195 = vst.msk [vmem:[%s485_s6] sm:$0xff] %vm190_vm4, %v194_v33 }

</bundles_post_ra>
